<compile_context>
chip_gen: v5e
topology: v5e:2x2
jax: 0.10.0
libtpu: 0.0.40
codegen_flags: <defaults>
</compile_context>

<pallas_src>
import functools

import jax
import jax.numpy as jnp
from jax import lax
from jax.experimental import pallas as pl
from jax.experimental.pallas import tpu as pltpu


# ----------------------------- module hyper-params -----------------------------
def _set_params(kernel_size: int):
    """Same rule as ConvBlock._set_params (keeps seq_len unchanged, stride=1)."""
    if kernel_size % 2 == 1:
        return 1, (kernel_size - 1) // 2
    return 2, kernel_size - 1


def _round_up(a: int, m: int) -> int:
    return (a + m - 1) // m * m


def spectral_normalize(w, n_power_iterations=10, eps=1e-12, seed=1):
    """torch.nn.utils.spectral_norm semantics: divide the weight by its largest
    singular value, estimated by power iteration on the (C_out, C_in*K) matrix."""
    # TODO(synk): torch keeps a persistent `u` buffer across forward passes; here the
    # power iteration restarts from a fixed-seed `u` (10 iterations) every prep call.
    c_out = w.shape[0]
    w_mat = w.reshape(c_out, -1)                       # (C_out, C_in*K)
    u = jax.random.normal(jax.random.PRNGKey(seed), (c_out,), dtype=w.dtype)
    u = u / (jnp.linalg.norm(u) + eps)
    v = None
    for _ in range(n_power_iterations):
        v = w_mat.T @ u
        v = v / (jnp.linalg.norm(v) + eps)
        u = w_mat @ v
        u = u / (jnp.linalg.norm(u) + eps)
    sigma = u @ (w_mat @ v)
    return w / sigma


def _vmem_capacity_bytes() -> int:
    """Per-generation VMEM capacity; conservative (v7x-sized) fallback."""
    try:
        cap = getattr(pltpu.get_tpu_info(), "vmem_capacity_bytes", None)
        if cap:
            return int(cap)
    except Exception:
        pass
    return 64 * 1024 * 1024


# --------------------------------- Pallas kernel --------------------------------
def conv_block_kernel(x_ref, w_ref, b_ref, o_ref, col_ref, *,
                      n_taps, dilation, l_tile, c_in_pad, relu_slope, single_tile):
    # x_ref:   (C_in_pad, L_in_pad)         compute dtype (full padded length per batch)
    # w_ref:   (C_out, n_taps*C_in_pad)     compute dtype
    # b_ref:   (C_out, 1)                   f32
    # o_ref:   (C_out, l_tile)              out dtype
    # col_ref: (n_taps*C_in_pad, l_tile)    compute dtype VMEM scratch
    #
    # In-kernel tap fold: assemble this lane tile's im2col block in VMEM (cheap
    # in-VMEM copies; per-tap lane offset is a small static shift on top of a
    # 128-aligned base), then one folded-contraction MXU dot, fp32 accumulation.
    if single_tile:
        base = 0                                            # fully static slices
    else:
        base = pl.multiple_of(pl.program_id(1) * l_tile, 128)
    for k in range(n_taps):
        col_ref[k * c_in_pad:(k + 1) * c_in_pad, :] = (
            x_ref[:, pl.ds(base + k * dilation, l_tile)])

    acc = jnp.dot(w_ref[...], col_ref[...], preferred_element_type=jnp.float32)
    acc = acc + b_ref[...]                              # bias broadcast over lanes (fp32)
    acc = jnp.where(acc > 0, acc, relu_slope * acc)     # LeakyReLU (fp32 epilogue)
    o_ref[...] = acc.astype(o_ref.dtype)


# --------------------------------- wrapper ---------------------------------------
def prepare_conv_block_params(weight, bias, kernel_size, compute_dtype=jnp.bfloat16):
    """Spectral-normalize the Conv1d weight and lay it out for the kernel.

    Hoisted out of the per-forward path (the normalized weight is constant at
    inference). Returns (w2, b2d): w2 is (C_out, K*C_in_pad), k-major over C_in."""
    c_out, c_in, k = weight.shape
    assert k == kernel_size
    c_in_pad = _round_up(c_in, 16)                     # sublane-pack friendly
    w_sn = spectral_normalize(weight)
    w2 = jnp.transpose(w_sn, (0, 2, 1))                # (C_out, K, C_in)
    w2 = jnp.pad(w2, ((0, 0), (0, 0), (0, c_in_pad - c_in)))
    w2 = w2.reshape(c_out, kernel_size * c_in_pad).astype(compute_dtype)
    b2d = bias.reshape(c_out, 1).astype(jnp.float32)
    return w2, b2d


def conv_block_apply(x, w2, b2d, *, kernel_size, relu_slope, out_dtype=None):
    """x: (B, C_in, L). Returns (B, C_out, L) in out_dtype (default x.dtype).

    Pass out_dtype=jnp.bfloat16 when the consumer tolerates it (e.g. the next
    ConvBlock casts to bf16 anyway) to halve output write-back bytes."""
    dilation, padding = _set_params(kernel_size)
    B, C_in, L = x.shape
    C_out, CKp = w2.shape
    C_in_pad = CKp // kernel_size
    assert C_in <= C_in_pad
    compute_dtype = w2.dtype
    if out_dtype is None:
        out_dtype = x.dtype
    halo = (kernel_size - 1) * dilation                # == 2 * padding

    # ---- lane-tile selection from a per-generation VMEM budget ----
    cb = jnp.dtype(compute_dtype).itemsize
    ob = jnp.dtype(out_dtype).itemsize
    vmem_cap = _vmem_capacity_bytes()
    budget = int(vmem_cap * 3 // 4)                    # headroom for compiler temporaries
    fixed = 2 * C_in_pad * (L + halo + 128) * cb       # full-L input block (double-buffered)
    fixed += 2 * C_out * CKp * cb + 2 * C_out * 4      # weight + bias buffers
    per_lane = 2 * C_out * ob + CKp * cb               # output (double-buffered) + col scratch
    avail = budget - fixed - (1 << 20)
    l_cap = min(max(128, avail // per_lane), 4096) if avail > 0 else 128

    if L <= l_cap:
        l_tile, n_j, L_pad, single_tile = L, 1, L, True
    else:
        l_tile = (l_cap // 128) * 128
        for cand in range(l_tile, 511, -128):          # prefer a tile dividing L exactly
            if L % cand == 0:
                l_tile = cand
                break
        n_j = -(-L // l_tile)
        L_pad = n_j * l_tile
        single_tile = False
    L_in_pad = L_pad + halo
    # TODO(synk): for extremely long sequences the full-length per-batch input block may
    # exceed VMEM; a halo-tiled manual-DMA input path would be needed for that regime.

    # single fused pad + cast pass over the input (channel pad + conv pad + tile pad)
    x_p = jnp.pad(x, ((0, 0), (0, C_in_pad - C_in),
                      (padding, L_in_pad - padding - L))).astype(compute_dtype)

    kernel = functools.partial(
        conv_block_kernel, n_taps=kernel_size, dilation=dilation, l_tile=l_tile,
        c_in_pad=C_in_pad, relu_slope=relu_slope, single_tile=single_tile)

    out = pl.pallas_call(
        kernel,
        out_shape=jax.ShapeDtypeStruct((B, C_out, L_pad), out_dtype),
        grid_spec=pltpu.PrefetchScalarGridSpec(
            num_scalar_prefetch=0,
            grid=(B, n_j),
            in_specs=[
                # full padded length per batch; block index is constant across the
                # lane-tile axis, so the pipeline only DMAs it once per batch
                pl.BlockSpec((None, C_in_pad, L_in_pad), lambda b, j: (b, 0, 0)),
                # weight / bias are grid-invariant (copied once; buffers are small)
                pl.BlockSpec((C_out, CKp), lambda b, j: (0, 0)),
                pl.BlockSpec((C_out, 1), lambda b, j: (0, 0)),
            ],
            out_specs=pl.BlockSpec((None, C_out, l_tile), lambda b, j: (b, 0, j)),
            scratch_shapes=[pltpu.VMEM((CKp, l_tile), compute_dtype)],
        ),
        compiler_params=pltpu.CompilerParams(
            dimension_semantics=("parallel", "parallel"),
            vmem_limit_bytes=budget,
        ),
        cost_estimate=pl.CostEstimate(
            flops=2 * B * C_out * CKp * L_pad,
            transcendentals=0,
            bytes_accessed=(B * C_in_pad * L_in_pad * cb + C_out * CKp * cb
                            + C_out * 4 + B * C_out * L_pad * ob),
        ),
    )(x_p, w2, b2d)

    return out if L_pad == L else out[:, :, :L]


def conv_block_forward(x, weight, bias, kernel_size, relu_slope,
                       compute_dtype=jnp.bfloat16, out_dtype=None):
    """Full ConvBlock forward (normalization='spectral'): spectral-norm Conv1d + LeakyReLU."""
    # TODO(synk): only the normalization='spectral' branch is implemented
    # (the BatchNorm1d path of the module is omitted).
    w2, b2d = prepare_conv_block_params(weight, bias, kernel_size, compute_dtype)
    return conv_block_apply(x, w2, b2d, kernel_size=kernel_size,
                            relu_slope=relu_slope, out_dtype=out_dtype)


# --------------------------------- reference -----------------------------------
def conv_block_reference(x, weight, bias, kernel_size, relu_slope,
                         compute_dtype=jnp.bfloat16, out_dtype=None):
    dilation, padding = _set_params(kernel_size)
    w_sn = spectral_normalize(weight)
    y = lax.conv_general_dilated(
        x.astype(compute_dtype), w_sn.astype(compute_dtype),
        window_strides=(1,),
        padding=[(padding, padding)],
        rhs_dilation=(dilation,),
        dimension_numbers=("NCH", "OIH", "NCH"),
        preferred_element_type=jnp.float32,
    )
    y = y + bias[None, :, None].astype(jnp.float32)
    y = jnp.where(y > 0, y, relu_slope * y)
    return y.astype(out_dtype if out_dtype is not None else x.dtype)


# ----------------------------------- main ---------------------------------------
if __name__ == "__main__":
    # ConvBlock(in_channels=4, out_channels=8, kernel_size=K, relu_slope=0.2)
    B, C_in, C_out, L = 2, 4, 8, 16
    relu_slope = 0.2
    key = jax.random.PRNGKey(0)

    for kernel_size in (3, 4):      # odd (dilation 1) and even (dilation 2) branches
        kx, kw, kb, key = jax.random.split(key, 4)
        x = jax.random.normal(kx, (B, C_in, L), dtype=jnp.float32)
        # deterministic init mirroring nn.Conv1d's uniform(-1/sqrt(fan_in), 1/sqrt(fan_in))
        fan_in = C_in * kernel_size
        bound = 1.0 / (fan_in ** 0.5)
        weight = jax.random.uniform(kw, (C_out, C_in, kernel_size), jnp.float32,
                                    -bound, bound)
        bias = jax.random.uniform(kb, (C_out,), jnp.float32, -bound, bound)

        # parameter prep (spectral norm + layout) hoisted out of the forward path
        w2, b2d = prepare_conv_block_params(weight, bias, kernel_size)
        fwd = jax.jit(functools.partial(conv_block_apply, kernel_size=kernel_size,
                                        relu_slope=relu_slope))
        out = jax.block_until_ready(fwd(x, w2, b2d))

        ref = conv_block_reference(x, weight, bias, kernel_size, relu_slope)
        assert out.shape == (B, C_out, L)
        assert out.dtype == x.dtype
        assert jnp.allclose(out, ref, atol=2e-4, rtol=2e-4), \
            f"mismatch vs reference conv (kernel_size={kernel_size})"

    print("KERNEL_OK")
</pallas_src>

<mosaic_0001>
module attributes {stable_mosaic.version = 11 : i64} {
  func.func @conv_block_kernel(%arg0: i32, %arg1: i32, %arg2: memref<1x16x18xbf16, #tpu.memory_space<vmem>>, %arg3: memref<8x48xbf16, #tpu.memory_space<vmem>>, %arg4: memref<8x1xf32, #tpu.memory_space<vmem>>, %arg5: memref<1x8x16xf32, #tpu.memory_space<vmem>>, %arg6: memref<48x16xbf16, #tpu.memory_space<vmem>>) attributes {dimension_semantics = [#tpu.dimension_semantics<parallel>, #tpu.dimension_semantics<parallel>], iteration_bounds = array<i64: 2, 1>, scalar_prefetch = 0 : i64, scratch_operands = 1 : i64, tpu.core_type = #tpu.core_type<tc>, window_params = [{transform_indices = @transform_0, window_bounds = array<i64: 1, 16, 18>}, {pipeline_mode = #tpu.pipeline_mode<synchronous>, transform_indices = @transform_1, window_bounds = array<i64: 8, 48>}, {pipeline_mode = #tpu.pipeline_mode<synchronous>, transform_indices = @transform_2, window_bounds = array<i64: 8, 1>}, {transform_indices = @transform_3, window_bounds = array<i64: 1, 8, 16>}]} {
    %c0 = arith.constant 0 : index
    %c0_0 = arith.constant 0 : index
    %c0_1 = arith.constant 0 : index
    %0 = vector.load %arg2[%c0, %c0_0, %c0_1] : memref<1x16x18xbf16, #tpu.memory_space<vmem>>, vector<1x16x16xbf16>
    %1 = vector.shape_cast %0 : vector<1x16x16xbf16> to vector<16x16xbf16>
    %c0_2 = arith.constant 0 : index
    %c0_3 = arith.constant 0 : index
    %2 = vector.load %arg6[%c0_2, %c0_3] : memref<48x16xbf16, #tpu.memory_space<vmem>>, vector<16x16xbf16>
    tpu.vector_store %arg6[%c0_2, %c0_3], %1 {strides = array<i32>} : memref<48x16xbf16, #tpu.memory_space<vmem>>, vector<16x16xbf16>,
    %c0_4 = arith.constant 0 : index
    %c0_5 = arith.constant 0 : index
    %c1 = arith.constant 1 : index
    %3 = vector.load %arg2[%c0_4, %c0_5, %c1] : memref<1x16x18xbf16, #tpu.memory_space<vmem>>, vector<1x16x16xbf16>
    %4 = vector.shape_cast %3 : vector<1x16x16xbf16> to vector<16x16xbf16>
    %c16 = arith.constant 16 : index
    %c0_6 = arith.constant 0 : index
    %5 = vector.load %arg6[%c16, %c0_6] : memref<48x16xbf16, #tpu.memory_space<vmem>>, vector<16x16xbf16>
    tpu.vector_store %arg6[%c16, %c0_6], %4 {strides = array<i32>} : memref<48x16xbf16, #tpu.memory_space<vmem>>, vector<16x16xbf16>,
    %c0_7 = arith.constant 0 : index
    %c0_8 = arith.constant 0 : index
    %c2 = arith.constant 2 : index
    %6 = vector.load %arg2[%c0_7, %c0_8, %c2] : memref<1x16x18xbf16, #tpu.memory_space<vmem>>, vector<1x16x16xbf16>
    %7 = vector.shape_cast %6 : vector<1x16x16xbf16> to vector<16x16xbf16>
    %c32 = arith.constant 32 : index
    %c0_9 = arith.constant 0 : index
    %8 = vector.load %arg6[%c32, %c0_9] : memref<48x16xbf16, #tpu.memory_space<vmem>>, vector<16x16xbf16>
    tpu.vector_store %arg6[%c32, %c0_9], %7 {strides = array<i32>} : memref<48x16xbf16, #tpu.memory_space<vmem>>, vector<16x16xbf16>,
    %c0_10 = arith.constant 0 : index
    %c0_11 = arith.constant 0 : index
    %9 = vector.load %arg3[%c0_10, %c0_11] : memref<8x48xbf16, #tpu.memory_space<vmem>>, vector<8x48xbf16>
    %c0_12 = arith.constant 0 : index
    %c0_13 = arith.constant 0 : index
    %10 = vector.load %arg6[%c0_12, %c0_13] : memref<48x16xbf16, #tpu.memory_space<vmem>>, vector<48x16xbf16>
    %cst = arith.constant dense<0.000000e+00> : vector<8x16xf32>
    %11 = tpu.matmul %9, %10, %cst {dimension_numbers = #tpu.dot_dimension_numbers<[1], [0], [0], [1], [0, 0, 1, 1], [], []>} : vector<8x48xbf16>, vector<48x16xbf16>, vector<8x16xf32> -> vector<8x16xf32>
    %c0_14 = arith.constant 0 : index
    %c0_15 = arith.constant 0 : index
    %12 = vector.load %arg4[%c0_14, %c0_15] : memref<8x1xf32, #tpu.memory_space<vmem>>, vector<8x1xf32>
    %13 = vector.broadcast %12 : vector<8x1xf32> to vector<8x16xf32>
    %14 = arith.addf %11, %13 : vector<8x16xf32>
    %cst_16 = arith.constant 0.000000e+00 : f32
    %15 = vector.broadcast %cst_16 : f32 to vector<8x16xf32>
    %16 = arith.cmpf ogt, %14, %15 : vector<8x16xf32>
    %cst_17 = arith.constant 2.000000e-01 : f32
    %17 = vector.broadcast %cst_17 : f32 to vector<8x16xf32>
    %18 = arith.mulf %17, %14 : vector<8x16xf32>
    %19 = arith.select %16, %14, %18 : vector<8x16xi1>, vector<8x16xf32>
    %c0_18 = arith.constant 0 : index
    %c0_19 = arith.constant 0 : index
    %c0_20 = arith.constant 0 : index
    %20 = vector.load %arg5[%c0_18, %c0_19, %c0_20] : memref<1x8x16xf32, #tpu.memory_space<vmem>>, vector<1x8x16xf32>
    %21 = vector.shape_cast %20 : vector<1x8x16xf32> to vector<8x16xf32>
    %22 = vector.shape_cast %19 : vector<8x16xf32> to vector<1x8x16xf32>
    tpu.vector_store %arg5[%c0_18, %c0_19, %c0_20], %22 {strides = array<i32>} : memref<1x8x16xf32, #tpu.memory_space<vmem>>, vector<1x8x16xf32>,
    return
  }
  func.func @transform_0(%arg0: i32, %arg1: i32) -> (i32, i32, i32) {
    %c0_i32 = arith.constant 0 : i32
    %c0_i32_0 = arith.constant 0 : i32
    %c0_i32_1 = arith.constant 0 : i32
    return %arg0, %c0_i32, %c0_i32_0 : i32, i32, i32
  }
  func.func @transform_1(%arg0: i32, %arg1: i32) -> (i32, i32) {
    %c0_i32 = arith.constant 0 : i32
    %c0_i32_0 = arith.constant 0 : i32
    %c0_i32_1 = arith.constant 0 : i32
    return %c0_i32, %c0_i32_0 : i32, i32
  }
  func.func @transform_2(%arg0: i32, %arg1: i32) -> (i32, i32) {
    %c0_i32 = arith.constant 0 : i32
    %c0_i32_0 = arith.constant 0 : i32
    %c0_i32_1 = arith.constant 0 : i32
    return %c0_i32, %c0_i32_0 : i32, i32
  }
  func.func @transform_3(%arg0: i32, %arg1: i32) -> (i32, i32, i32) {
    %c0_i32 = arith.constant 0 : i32
    %c0_i32_0 = arith.constant 0 : i32
    return %arg0, %c0_i32, %arg1 : i32, i32, i32
  }
}

</mosaic_0001>

<bundles_post_ra>
// kernel: conv_block_apply.1
= control target key start
LH: loop header
LB: loop body
LE: loop exit
PB: predicated region body
PF: predicated region fallthrough
CT: control target
= control target key end

     0   :  { %8 = vsyncpa [#allocation4], 0  ;;  %s652_s0 = inlined_call_operand.vmem [shape: bf16[2,16,18], index: 0, kind: input, shape index: {}]   ;;  %s653_s1 = inlined_call_operand.vmem [shape: bf16[8,48], index: 1, kind: input, shape index: {}]   ;;  %s654_s2 = inlined_call_operand.vmem [shape: f32[8,1], index: 2, kind: input, shape index: {}]   ;;  %s655_s3 = inlined_call_operand.hbm [shape: f32[2,8,16], index: 3, kind: output, shape index: {}]  }
   0x1   :  { %10 = vsyncpa [#allocation4 + $0x1], 0  ;;  %s543_s12 = smov 0   ;;  %s545_s13 = smov 0  }
   0x2   :  { %s547_s14 = smov 0   ;;  %s549_s15 = smov 0  }
   0x3   :  { %s551_s16 = smov 0   ;;  %s553_s17 = smov 0  }
   0x4 LB: > { %s351_s18 = sadd.s32 4294967295, %s518_s17   ;;  %s352_s19 = sadd.s32 4294967294, %s518_s17   ;;  %s518_s17 = sphi %s553_s17, %s16_s17   ;;  %s514_s16 = sphi %s551_s16, %s662_s16   ;;  %s510_s15 = sphi %s549_s15, %s661_s15   ;;  %s506_s14 = sphi %s547_s14, %s660_s14   ;;  %s502_s13 = sphi %s545_s13, %s659_s13   ;;  %s498_s12 = sphi %s543_s12, %s658_s12  }
   0x5   : > { %s28_s20 = sadd.s32 1, %s514_s16  ;;  %s105_s21 = sadd.s32 1, %s506_s14 }
   0x6   : > { %p30_p0 = scmp.ge.s32.totalorder %s28_s20, 2  ;;  %p115_p1 = scmp.ne.s32.totalorder %s506_s14, %s502_s13 }
   0x7   : > { %p116_p2 = scmp.eq.s32.totalorder %s351_s18, 1  ;;  %p121_p3 = scmp.ne.s32.totalorder %s502_s13, %s498_s12 }
   0x8   : > { %s664_s20 = smov (%p30_p0, %s28_s20), 0  ;;  %p122_p5 = scmp.eq.s32.totalorder %s352_s19, 1 }
   0x9   : > { %p583_p4 = por %p116_p2, %p115_p1  ;;  %s100_s23 = ssub.s32 %s514_s16, %s664_s20 }
   0xa   : > { %p355_p6 = scmp.ge.s32.totalorder %s518_s17, 1  ;;  %p103_p7 = scmp.eq.s32.totalorder %s100_s23, 0 }
   0xb   : > { %p590_p8 = por %p122_p5, %p121_p3  ;;  %p154_p9 = scmp.lt.s32.totalorder %s518_s17, 3 }
   0xc   : > { %s596_s25 = scalar_select %p103_p7, %s506_s14, %s105_s21  }
   0xd   : > { %p155_p10 = pnand %p355_p6, %p154_p9 }
   0xe   : > { %p178_p11 = scmp.lt.s32.totalorder (!%p155_p10), %s510_s15, 1  ;;  %s520_s4 = smov (!%p155_p10), 126  }
   0xf   : > { %158 = sbr.rel (%p155_p10) target bundleno = 301 (0x12d), region = 32  ;;  %s521_s5 = smov (!%p155_p10), 127  }
  0x10   : > { %s175_s10 = sand.u32 (!%p155_p10), 1, %s502_s13   ;;  %s373_s18 = sshll.u32 (!%p155_p10), %s510_s15, 3 }
  0x11   : > { %s356_s11 = sshll.u32 (!%p155_p10), %s175_s10, 3  ;;  %s278_s23 = scalar_lea.hbm (!%p155_p10), %s655_s3, %s373_s18 }
  0x12   : > { %s282_s28 = sshll.u32 (!%p155_p10), %s278_s23, 4  ;;  %s267_s29 = scalar_lea.sflag (!%p155_p10), [#allocation4], %s175_s10  ;;  %s283_s28 = int_to_ptr.hbm [resolvable:$true] %s282_s28 }
  0x13   : > { %s460_s6 = scalar_lea.hbm (!%p155_p10), %s655_s3, 16 }
  0x14   : > { %s179_s26 = scalar_select %p178_p11, %s510_s15, 1  ;;  %vm186_vm0 = vcmask 125952   ;;  %v220_v6 = vld [vmem:[%s654_s2] sm:$0xff]  ;;  %v522_v7 = vmov 0   ;;  %vm244_vm1 = vcmask 392192   ;;  %vm264_vm3 = vcmask 130048  }
  0x15   : > { %438 = vset.pattern.permute.xlu2 %v522_v7  ;;  %439 = vset.pattern.permute.xlu0 %v522_v7  ;;  %v213_v15 = vld [vmem:[%s653_s1] sm:$0xf]  ;;  %s454_s15 = sshra.s32 %s283_s28, 4  ;;  %s455_s15 = int_to_ptr.hbm [resolvable:$true] %s454_s15 }
  0x16   : > { %s376_s27 = sshll.u32 %s179_s26, 3  ;;  %223 = vperm.xlu2 %438, %v220_v6   ;;  %s177_s26 = scalar_lea.vmem [#allocation3], %s356_s11 }
  0x17   : > { %s182_s30 = scalar_lea.vmem %s652_s0, %s376_s27  ;;  %s280_s27 = sshll.u32 %s177_s26, 4  ;;  %s281_s27 = int_to_ptr.vmem [resolvable:$true] %s280_s27 }
  0x18   : > { %v201_v0 = vld [vmem:[%s182_s30] sm:$0xf]  ;;  %v185_v2 = vld [vmem:[%s182_s30 + $0x4] sm:$0xf]  ;;  %p461_p1 = scmp.lt.s32.totalorder %s455_s15, %s655_s3 }
  0x19   : > { %v184_v1 = vld [vmem:[%s182_s30] sm:$0xf]  ;;  %205 = vrot.lane.b32.xlu0 %v201_v0, %s520_s4  ;;  %188 = vst.msk [vmem:[#allocation2 + $0x4] sm:$0xf] %vm186_vm0, %v185_v2  ;;  %v202_v4 = vld [vmem:[%s182_s30 + $0x4] sm:$0xf] }
  0x1a   : > { %v189_v3 = vld [vmem:[%s182_s30] sm:$0xf]  ;;  %187 = vst.msk [vmem:[#allocation2] sm:$0xf] %vm186_vm0, %v184_v1  ;;  %v190_v5 = vld [vmem:[%s182_s30 + $0x4] sm:$0xf] }
  0x1b   : > { %193 = vrot.lane.b32.xlu1 %v189_v3, %s521_s5  ;;  %s456_s30 = scalar_lea.hbm %s455_s15, 8 }
  0x1c   : > { %p457_p12 = scmp.ne.s32.totalorder %s455_s15, %s456_s30  ;;  %p462_p2 = scmp.lt.s32.totalorder %s460_s6, %s456_s30 }
  0x1e   : > { %p458_p13 = pnand %p457_p12, %p583_p4  ;;  %p463_p3 = por %p462_p2, %p461_p1 }
  0x20   : > { %p459_p0 = pneg %p458_p13 }
  0x21   : > { %207 = vrot.lane.b32.xlu0 %v202_v4, %s520_s4  ;;  %v377_v14 = vld [vmem:[#allocation2] sm:$0xff] }
  0x22   : > { %p464_p5 = pnand %p463_p3, %p459_p0 }
  0x23   : > { %195 = vrot.lane.b32.xlu1 %v190_v5, %s521_s5 }
  0x70   : > { %v224_v16 = vpop.permute.xlu2 %223 }
  0x8b   : > { %v206_v8 = vpop.permute.xlu0 %205 }
  0x8c   : > { %211 = vst.msk [vmem:[#allocation2 + $0x10] sm:$0xf] %vm186_vm0, %v206_v8 }
  0x8d   : > { %v194_v9 = vpop.permute.xlu1 %193 }
  0x8e   : > { %199 = vst.msk [vmem:[#allocation2 + $0x8] sm:$0xf] %vm186_vm0, %v194_v9 }
  0x93   : > { %v208_v10 = vpop.permute.xlu0 %207 }
  0x94   : > { %212 = vst.msk [vmem:[#allocation2 + $0x14] sm:$0xf] %vm186_vm0, %v208_v10 }
  0x95   : > { %v196_v11 = vpop.permute.xlu1 %195 }
  0x96   : > { %200 = vst.msk [vmem:[#allocation2 + $0xc] sm:$0xf] %vm186_vm0, %v196_v11 }
  0x9b   : > { %v379_v12 = vld [vmem:[#allocation2 + $0x10] sm:$0xff] }
  0x9c   : > { %253 = vmatpush.bf16.msra.mxu0 %v379_v12 }
  0x9d   : > { %v378_v13 = vld [vmem:[#allocation2 + $0x8] sm:$0xff] }
  0xa0   : > { %254 = vmatpush.bf16.msra.mxu0 %v378_v13 }
  0xa4   : > { %255 = vmatpush.bf16.msra.mxu0 %v377_v14 }
  0xa7   : > { %371 = vmatmul.msk.bf16.vlgmr.msra.gmra.mxu0 %vm244_vm1, %v213_v15 }
 0x124   : > { %v257_v17 = vpop.f32.mrf.mxu0 }
 0x125   : > { %v258_v18 = vadd.f32 %v257_v17, %v224_v16 }
 0x127   : > { %vm261_vm2 = vcmp.gt.f32.partialorder %v258_v18, 0.0  ;;  %v262_v19 = vmul.f32 0.2, %v258_v18 }
 0x129   : > { %v263_v20 = vsel %vm261_vm2, %v258_v18, %v262_v19 }
 0x12a   : > { %265 = vst.msk [vmem:[%s177_s26] sm:$0xff] %vm264_vm3, %v263_v20 }
 0x12b   : > { %467 = shalt.err (!%p464_p5)
}
 0x12c   : > { %380 = dma.vmem_to_hbm [thread:$0]  (%p583_p4), %s281_s27, 128, %s283_s28, %s267_s29   ;;  %v259_v21 = vpop.f32.mrf.mxu0 }
 0x12d PF: > { %p386_p6 = scmp.ge.s32.totalorder %s518_s17, 2  ;;  %s294_s9 = sand.u32 1, %s498_s12  }
 0x12e   : > { %s295_s10 = scalar_lea.sflag [#allocation4], %s294_s9 }
 0x12f   : > { %p383_p7 = pnand %p386_p6, %p590_p8 }
 0x131   : > { %p384_p9 = pneg %p383_p7 }
 0x133   : > { %493 = dma.done.wait (%p384_p9), %s295_s10, 128  }
 0x134   : > { %495 = vsyncadd (%p384_p9), %s295_s10, 4294967168  ;;  %s16_s17 = sadd.s32 1, %s518_s17   ;;  %s658_s12 = smov %s502_s13 }
 0x135   : > { %p13_p10 = scmp.ge.s32.totalorder %s16_s17, 4   ;;  %s659_s13 = smov %s506_s14 }
 0x136   : > { %s660_s14 = smov %s596_s25  ;;  %s661_s15 = smov %s514_s16 }
 0x137   : > { %s662_s16 = smov %s664_s20  ;;  %15 = sbr.rel (!%p13_p10) target bundleno = 4 (0x4), region = 67 }
 0x13c   :  { %301 = vsyncpa [#allocation4], 1 }
 0x13d   :  { %303 = vsyncpa [#allocation4 + $0x1], 1 }

</bundles_post_ra>
